<compile_context>
chip_gen: v5e
topology: v5e:2x2
jax: 0.10.0
libtpu: 0.0.40
codegen_flags: <defaults>
</compile_context>

<pallas_src>
import jax
import jax.numpy as jnp
from jax import lax
from jax.experimental import pallas as pl
from jax.experimental.pallas import tpu as pltpu


def _round_up(x, m):
    return ((x + m - 1) // m) * m


def _bag_matmul_kernel(segids_ref, table_ref, out_ref, counts_ref):
    """Grid = (bag block i, vocab tile k, token block j); j innermost.

    segids_ref : VMEM (2, TL)  int32 -- row 0: per-token bag id, row 1: vocab id
    table_ref  : VMEM (TV, Dp) bf16  -- one vocab tile of the embedding table
    out_ref    : VMEM (TB, Dp) f32   -- output block, resident across k and j
    counts_ref : VMEM (TB, TV) f32   -- per-(bag, vocab-row) token counts
    """
    k = pl.program_id(1)
    j = pl.program_id(2)
    nj = pl.num_programs(2)

    tb = out_ref.shape[0]
    tv = counts_ref.shape[1]
    tl = segids_ref.shape[1]

    @pl.when((k == 0) & (j == 0))
    def _():
        out_ref[...] = jnp.zeros_like(out_ref)

    @pl.when(j == 0)
    def _():
        counts_ref[...] = jnp.zeros_like(counts_ref)

    b0 = pl.program_id(0) * tb
    v0 = k * tv

    seg = segids_ref[0:1, :]  # (1, TL) per-token bag id
    ids = segids_ref[1:2, :]  # (1, TL) per-token vocab id

    # bf16 one-hots (exact 0/1) -> both GEMMs run at the MXU bf16 rate.
    # Padding tokens (seg == ids == -1) and ids outside this tile match nothing.
    bag_iota = lax.broadcasted_iota(jnp.int32, (tb, tl), 0) + b0
    s_mat = (seg == bag_iota).astype(jnp.bfloat16)             # (TB, TL)

    voc_iota = lax.broadcasted_iota(jnp.int32, (tv, tl), 0) + v0
    o_t = (ids == voc_iota).astype(jnp.bfloat16)               # (TV, TL)

    # counts[b, v] += #tokens of bag b hitting vocab row v in this token block.
    # Contract both operands on the TL (lane) axis (A @ B^T form).
    counts_ref[...] += lax.dot_general(
        s_mat, o_t,
        dimension_numbers=(((1,), (1,)), ((), ())),
        preferred_element_type=jnp.float32)

    # The (TV, Dp) table tile is only consumed once per (bag block, vocab tile):
    # a single counts @ table GEMM after the last token block.
    @pl.when(j == nj - 1)
    def _():
        # Counts are exact integers (f32 in VMEM); the bf16 cast is lossless for
        # per-(bag, vocab-row) totals <= 256, which holds for realistic text bags.
        out_ref[...] += jnp.dot(
            counts_ref[...].astype(table_ref.dtype), table_ref[...],
            preferred_element_type=jnp.float32)


@jax.jit
def _pin_text_embed(ids_tuple, offs_tuple, table):
    """Sum of EmbeddingBag(mode='sum') over all text features. Returns (B, D)."""
    B = offs_tuple[0].shape[0]
    V, D = table.shape

    # Per-token bag (segment) ids via searchsorted on each feature's offsets;
    # all features are concatenated into one flat token stream (the cross-feature
    # sum is a single segment-sum over the concatenation).
    ids_parts, seg_parts = [], []
    for ids, offs in zip(ids_tuple, offs_tuple):
        ids = ids.astype(jnp.int32)
        offs = offs.astype(jnp.int32)
        pos = jnp.arange(ids.shape[0], dtype=jnp.int32)
        seg = jnp.searchsorted(offs, pos, side="right").astype(jnp.int32) - 1
        ids_parts.append(ids)
        seg_parts.append(seg)
    ids_all = jnp.concatenate(ids_parts)
    seg_all = jnp.concatenate(seg_parts)
    n_tok = ids_all.shape[0]

    # ---- static tile selection (shapes are Python ints under jit) ----
    d_pad = _round_up(D, 128)
    tl = 256
    n_pad = _round_up(max(n_tok, 1), tl)

    tb = min(128, _round_up(B, 8))     # bag (M) tile; multiple of 8 sublanes
    b_pad = _round_up(B, tb)

    v_pad128 = _round_up(V, 128)
    if v_pad128 * d_pad * 2 <= 8 * 1024 * 1024:
        tv = v_pad128                  # whole padded table = one resident VMEM tile
    else:
        tv = 512                       # stream the table in 512-row vocab tiles
    v_pad = _round_up(V, tv)

    # ---- pad & lay out inputs (lane-dense int rows, bf16 table) ----
    seg_all = jnp.pad(seg_all, (0, n_pad - n_tok), constant_values=-1)
    ids_all = jnp.pad(ids_all, (0, n_pad - n_tok), constant_values=-1)
    segids = jnp.stack([seg_all, ids_all], axis=0)  # (2, n_pad) int32, lane-dense

    table_bf = jnp.pad(table, ((0, v_pad - V), (0, d_pad - D))).astype(jnp.bfloat16)

    n_bag_blocks = b_pad // tb
    n_vocab_tiles = v_pad // tv
    n_tok_blocks = n_pad // tl

    # ---- VMEM budget (v7x-safe cap) and cost estimate ----
    vmem_bytes = (2 * tv * d_pad * 2        # table tile, double-buffered, bf16
                  + 2 * 2 * tl * 4          # segids block, double-buffered
                  + 2 * tb * d_pad * 4      # output block
                  + tb * tv * 4             # counts scratch
                  + (4 << 20))              # headroom
    vmem_limit = int(min(max(vmem_bytes, 16 << 20), 48 << 20))

    flops = 2 * b_pad * v_pad * (n_pad + d_pad)
    bytes_accessed = (n_bag_blocks * v_pad * d_pad * 2
                      + n_bag_blocks * n_vocab_tiles * 2 * n_pad * 4
                      + b_pad * d_pad * 4)

    out = pl.pallas_call(
        _bag_matmul_kernel,
        out_shape=jax.ShapeDtypeStruct((b_pad, d_pad), jnp.float32),
        grid_spec=pltpu.PrefetchScalarGridSpec(
            num_scalar_prefetch=0,
            grid=(n_bag_blocks, n_vocab_tiles, n_tok_blocks),
            in_specs=[
                pl.BlockSpec((2, tl), lambda i, k, j: (0, j)),       # seg+token ids
                pl.BlockSpec((tv, d_pad), lambda i, k, j: (k, 0)),   # table vocab tile
            ],
            out_specs=pl.BlockSpec((tb, d_pad), lambda i, k, j: (i, 0)),
            scratch_shapes=[pltpu.VMEM((tb, tv), jnp.float32)],
        ),
        compiler_params=pltpu.CompilerParams(
            dimension_semantics=("parallel", "arbitrary", "arbitrary"),
            vmem_limit_bytes=vmem_limit,
        ),
        cost_estimate=pl.CostEstimate(
            flops=flops, transcendentals=0, bytes_accessed=bytes_accessed),
    )(segids, table_bf)

    return out[:B, :D].astype(table.dtype)


def pin_text_embedder(feats, table, feature_names, output_feature_name):
    """JAX/Pallas equivalent of PinTextEmbedder.forward."""
    assert output_feature_name not in feats, (
        f"{output_feature_name} already exists in feats"
    )
    ids_tuple = tuple(
        jnp.asarray(feats[f"{n}_input_ids"], jnp.int32) for n in feature_names
    )
    offs_tuple = tuple(
        jnp.asarray(feats[f"{n}_offsets"], jnp.int32) for n in feature_names
    )
    out = _pin_text_embed(ids_tuple, offs_tuple, jnp.asarray(table))
    new_feats = dict(feats)
    new_feats[output_feature_name] = out
    return new_feats


def _reference(feats, table, feature_names):
    """Pure-JAX reference: EmbeddingBag(mode='sum') per feature, summed over features.

    Uses the same bf16-quantized table as the kernel so the comparison is exact
    up to f32 summation order.
    """
    table_q = table.astype(jnp.bfloat16).astype(jnp.float32)
    D = table.shape[1]
    total = None
    for n in feature_names:
        ids = jnp.asarray(feats[f"{n}_input_ids"], jnp.int32)
        offs = jnp.asarray(feats[f"{n}_offsets"], jnp.int32)
        B = offs.shape[0]
        ends = jnp.concatenate([offs[1:], jnp.array([ids.shape[0]], jnp.int32)])
        rows = []
        for b in range(B):
            s, e = int(offs[b]), int(ends[b])
            if e > s:
                rows.append(table_q[ids[s:e]].sum(axis=0))
            else:
                rows.append(jnp.zeros((D,), jnp.float32))
        emb = jnp.stack(rows)
        total = emb if total is None else total + emb
    return total


if __name__ == "__main__":
    key = jax.random.PRNGKey(0)
    k_table, k_ids0, k_ids1 = jax.random.split(key, 3)

    V, D, B = 64, 64, 4
    feature_names = ["query_title", "query_description"]
    output_feature_name = "query_text_embedding"

    # Synthetic embedding table (nn.EmbeddingBag(V, D, mode='sum') weight).
    table = jax.random.normal(k_table, (V, D), dtype=jnp.float32)

    # Ragged token-id bags for each text feature.
    feats = {
        "query_title_input_ids": jax.random.randint(k_ids0, (10,), 0, V, dtype=jnp.int32),
        "query_title_offsets": jnp.array([0, 3, 5, 8], dtype=jnp.int32),
        "query_description_input_ids": jax.random.randint(k_ids1, (7,), 0, V, dtype=jnp.int32),
        "query_description_offsets": jnp.array([0, 2, 4, 6], dtype=jnp.int32),
    }

    out_feats = pin_text_embedder(feats, table, feature_names, output_feature_name)
    result = jax.block_until_ready(out_feats[output_feature_name])

    expected = _reference(feats, table, feature_names)
    assert result.shape == (B, D)
    assert jnp.allclose(result, expected, atol=1e-3, rtol=1e-3), "mismatch vs reference"

    print("KERNEL_OK")
</pallas_src>

<mosaic_0001>
module attributes {stable_mosaic.version = 11 : i64} {
  func.func @_bag_matmul_kernel(%arg0: i32, %arg1: i32, %arg2: i32, %arg3: memref<2x256xi32, #tpu.memory_space<vmem>>, %arg4: memref<128x128xbf16, #tpu.memory_space<vmem>>, %arg5: memref<8x128xf32, #tpu.memory_space<vmem>>, %arg6: memref<8x128xf32, #tpu.memory_space<vmem>>) attributes {dimension_semantics = [#tpu.dimension_semantics<parallel>, #tpu.dimension_semantics<arbitrary>, #tpu.dimension_semantics<arbitrary>], iteration_bounds = array<i64: 1, 1, 1>, scalar_prefetch = 0 : i64, scratch_operands = 1 : i64, tpu.core_type = #tpu.core_type<tc>, window_params = [{transform_indices = @transform_0, window_bounds = array<i64: 2, 256>}, {transform_indices = @transform_1, window_bounds = array<i64: 128, 128>}, {transform_indices = @transform_2, window_bounds = array<i64: 8, 128>}]} {
    %c0_i32 = arith.constant 0 : i32
    %0 = arith.cmpi eq, %arg1, %c0_i32 : i32
    %c0_i32_0 = arith.constant 0 : i32
    %1 = arith.cmpi eq, %arg2, %c0_i32_0 : i32
    %2 = arith.andi %0, %1 : i1
    %3 = arith.extui %2 : i1 to i32
    %c0_i32_1 = arith.constant 0 : i32
    %4 = arith.cmpi ne, %3, %c0_i32_1 : i32
    scf.if %4 {
      %cst_12 = arith.constant 0.000000e+00 : f32
      %35 = vector.broadcast %cst_12 : f32 to vector<8x128xf32>
      %c0_13 = arith.constant 0 : index
      %c0_14 = arith.constant 0 : index
      %36 = vector.load %arg5[%c0_13, %c0_14] : memref<8x128xf32, #tpu.memory_space<vmem>>, vector<8x128xf32>
      tpu.vector_store %arg5[%c0_13, %c0_14], %35 {strides = array<i32>} : memref<8x128xf32, #tpu.memory_space<vmem>>, vector<8x128xf32>,
    } else {
    }
    %c0_i32_2 = arith.constant 0 : i32
    %5 = arith.cmpi eq, %arg2, %c0_i32_2 : i32
    %6 = arith.extui %5 : i1 to i32
    %c0_i32_3 = arith.constant 0 : i32
    %7 = arith.cmpi ne, %6, %c0_i32_3 : i32
    scf.if %7 {
      %cst_12 = arith.constant 0.000000e+00 : f32
      %35 = vector.broadcast %cst_12 : f32 to vector<8x128xf32>
      %c0_13 = arith.constant 0 : index
      %c0_14 = arith.constant 0 : index
      %36 = vector.load %arg6[%c0_13, %c0_14] : memref<8x128xf32, #tpu.memory_space<vmem>>, vector<8x128xf32>
      tpu.vector_store %arg6[%c0_13, %c0_14], %35 {strides = array<i32>} : memref<8x128xf32, #tpu.memory_space<vmem>>, vector<8x128xf32>,
    } else {
    }
    %c8_i32 = arith.constant 8 : i32
    %8 = arith.muli %arg0, %c8_i32 : i32
    %c128_i32 = arith.constant 128 : i32
    %9 = arith.muli %arg1, %c128_i32 : i32
    %c0 = arith.constant 0 : index
    %c0_4 = arith.constant 0 : index
    %10 = vector.load %arg3[%c0, %c0_4] : memref<2x256xi32, #tpu.memory_space<vmem>>, vector<1x256xi32>
    %c1 = arith.constant 1 : index
    %c0_5 = arith.constant 0 : index
    %11 = vector.load %arg3[%c1, %c0_5] : memref<2x256xi32, #tpu.memory_space<vmem>>, vector<1x256xi32>
    %12 = tpu.iota {dimensions = array<i32: 0>} : vector<8x256xi32>
    %13 = vector.broadcast %8 : i32 to vector<8x256xi32>
    %14 = arith.addi %12, %13 : vector<8x256xi32>
    %15 = vector.broadcast %10 : vector<1x256xi32> to vector<8x256xi32>
    %16 = arith.cmpi eq, %15, %14 : vector<8x256xi32>
    %17 = arith.extui %16 : vector<8x256xi1> to vector<8x256xi32>
    %18 = arith.sitofp %17 : vector<8x256xi32> to vector<8x256xf32>
    %19 = arith.truncf %18 : vector<8x256xf32> to vector<8x256xbf16>
    %20 = tpu.iota {dimensions = array<i32: 0>} : vector<128x256xi32>
    %21 = vector.broadcast %9 : i32 to vector<128x256xi32>
    %22 = arith.addi %20, %21 : vector<128x256xi32>
    %23 = vector.broadcast %11 : vector<1x256xi32> to vector<128x256xi32>
    %24 = arith.cmpi eq, %23, %22 : vector<128x256xi32>
    %25 = arith.extui %24 : vector<128x256xi1> to vector<128x256xi32>
    %26 = arith.sitofp %25 : vector<128x256xi32> to vector<128x256xf32>
    %27 = arith.truncf %26 : vector<128x256xf32> to vector<128x256xbf16>
    %c0_6 = arith.constant 0 : index
    %c0_7 = arith.constant 0 : index
    %28 = vector.load %arg6[%c0_6, %c0_7] : memref<8x128xf32, #tpu.memory_space<vmem>>, vector<8x128xf32>
    %cst = arith.constant dense<0.000000e+00> : vector<8x128xf32>
    %29 = tpu.matmul %19, %27, %cst {dimension_numbers = #tpu.dot_dimension_numbers<[1], [1], [0], [0], [0, 0, 1, 0], [], []>} : vector<8x256xbf16>, vector<128x256xbf16>, vector<8x128xf32> -> vector<8x128xf32>
    %30 = arith.addf %28, %29 : vector<8x128xf32>
    %c0_8 = arith.constant 0 : index
    %c0_9 = arith.constant 0 : index
    %31 = vector.load %arg6[%c0_8, %c0_9] : memref<8x128xf32, #tpu.memory_space<vmem>>, vector<8x128xf32>
    tpu.vector_store %arg6[%c0_8, %c0_9], %30 {strides = array<i32>} : memref<8x128xf32, #tpu.memory_space<vmem>>, vector<8x128xf32>,
    %c0_i32_10 = arith.constant 0 : i32
    %32 = arith.cmpi eq, %arg2, %c0_i32_10 : i32
    %33 = arith.extui %32 : i1 to i32
    %c0_i32_11 = arith.constant 0 : i32
    %34 = arith.cmpi ne, %33, %c0_i32_11 : i32
    scf.if %34 {
      %c0_12 = arith.constant 0 : index
      %c0_13 = arith.constant 0 : index
      %35 = vector.load %arg5[%c0_12, %c0_13] : memref<8x128xf32, #tpu.memory_space<vmem>>, vector<8x128xf32>
      %c0_14 = arith.constant 0 : index
      %c0_15 = arith.constant 0 : index
      %36 = vector.load %arg6[%c0_14, %c0_15] : memref<8x128xf32, #tpu.memory_space<vmem>>, vector<8x128xf32>
      %37 = arith.truncf %36 : vector<8x128xf32> to vector<8x128xbf16>
      %c0_16 = arith.constant 0 : index
      %c0_17 = arith.constant 0 : index
      %38 = vector.load %arg4[%c0_16, %c0_17] : memref<128x128xbf16, #tpu.memory_space<vmem>>, vector<128x128xbf16>
      %cst_18 = arith.constant dense<0.000000e+00> : vector<8x128xf32>
      %39 = tpu.matmul %37, %38, %cst_18 {dimension_numbers = #tpu.dot_dimension_numbers<[1], [0], [0], [1], [0, 0, 1, 1], [], []>} : vector<8x128xbf16>, vector<128x128xbf16>, vector<8x128xf32> -> vector<8x128xf32>
      %40 = arith.addf %35, %39 : vector<8x128xf32>
      %c0_19 = arith.constant 0 : index
      %c0_20 = arith.constant 0 : index
      %41 = vector.load %arg5[%c0_19, %c0_20] : memref<8x128xf32, #tpu.memory_space<vmem>>, vector<8x128xf32>
      tpu.vector_store %arg5[%c0_19, %c0_20], %40 {strides = array<i32>} : memref<8x128xf32, #tpu.memory_space<vmem>>, vector<8x128xf32>,
    } else {
    }
    return
  }
  func.func @transform_0(%arg0: i32, %arg1: i32, %arg2: i32) -> (i32, i32) {
    %c0_i32 = arith.constant 0 : i32
    %c0_i32_0 = arith.constant 0 : i32
    return %c0_i32, %arg2 : i32, i32
  }
  func.func @transform_1(%arg0: i32, %arg1: i32, %arg2: i32) -> (i32, i32) {
    %c0_i32 = arith.constant 0 : i32
    %c0_i32_0 = arith.constant 0 : i32
    return %arg1, %c0_i32 : i32, i32
  }
  func.func @transform_2(%arg0: i32, %arg1: i32, %arg2: i32) -> (i32, i32) {
    %c0_i32 = arith.constant 0 : i32
    %c0_i32_0 = arith.constant 0 : i32
    return %arg0, %c0_i32 : i32, i32
  }
}

</mosaic_0001>

<bundles_post_ra>
// kernel: custom-call.2
= control target key start
LH: loop header
LB: loop body
LE: loop exit
PB: predicated region body
PF: predicated region fallthrough
CT: control target
= control target key end

     0   :  { %s6_s0 = inlined_call_operand.vmem [shape: u32[7], index: 0, kind: output, shape index: {}]  }

// kernel: custom-call
= control target key start
LH: loop header
LB: loop body
LE: loop exit
PB: predicated region body
PF: predicated region fallthrough
CT: control target
= control target key end

     0   :  { %s6_s0 = inlined_call_operand.vmem [shape: u32[10], index: 0, kind: output, shape index: {}]  }

// kernel: _pin_text_embed.1
= control target key start
LH: loop header
LB: loop body
LE: loop exit
PB: predicated region body
PF: predicated region fallthrough
CT: control target
= control target key end

     0   :  { %v27_v0 = vlaneseq  ;;  %v418_v9 = vmov 1.0|1.0   ;;  %s542_s0 = inlined_call_operand.vmem [shape: s32[2,256], index: 0, kind: input, shape index: {}]   ;;  %s543_s1 = inlined_call_operand.vmem [shape: bf16[128,128], index: 1, kind: input, shape index: {}]   ;;  %s544_s2 = inlined_call_operand.vmem [shape: f32[8,128], index: 2, kind: output, shape index: {}]  }
   0x1   :  { %v305_v1 = vld [vmem:[%s542_s0 + $0x1] ss:$2 sm:$0x3]  ;;  %v415_v18 = vld [vmem:[%s543_s1 + $0x38] sm:$0xff]  ;;  %v414_v19 = vld [vmem:[%s543_s1 + $0x30] sm:$0xff] }
   0x2   :  { %v437_v2 = vshrl.u32 %v27_v0, 7  ;;  %v439_v3 = vperm.slane %v305_v1, 0  ;;  %v441_v4 = vperm.slane %v305_v1, 1  ;;  %286 = vmatpush.bf16.msra.mxu2 %v415_v18  ;;  %v413_v22 = vld [vmem:[%s543_s1 + $0x28] sm:$0xff]  ;;  %v412_v23 = vld [vmem:[%s543_s1 + $0x20] sm:$0xff]  ;;  %v411_v25 = vld [vmem:[%s543_s1 + $0x18] sm:$0xff] }
   0x3   :  { %v24_v26 = vld [vmem:[%s542_s0] ss:$2 sm:$0x3]  ;;  %v410_v27 = vld [vmem:[%s543_s1 + $0x10] sm:$0xff]  ;;  %v409_v30 = vld [vmem:[%s543_s1 + $0x8] sm:$0xff] }
   0x4   :  { %v54_v5 = vadd.s32 112, %v437_v2  ;;  %v55_v6 = vadd.s32 120, %v437_v2  ;;  %v52_v7 = vadd.s32 96, %v437_v2  ;;  %v53_v8 = vadd.s32 104, %v437_v2  ;;  %v408_v31 = vld [vmem:[%s543_s1] sm:$0xff] }
   0x5   :  { %v50_v10 = vadd.s32 80, %v437_v2  ;;  %v51_v11 = vadd.s32 88, %v437_v2  ;;  %v48_v12 = vadd.s32 64, %v437_v2  ;;  %v49_v13 = vadd.s32 72, %v437_v2 }
   0x6   :  { %vm103_vm0 = vcmp.eq.s32.totalorder %v439_v3, %v54_v5  ;;  %vm105_vm1 = vcmp.eq.s32.totalorder %v439_v3, %v55_v6  ;;  %vm104_vm2 = vcmp.eq.s32.totalorder %v441_v4, %v54_v5  ;;  %vm106_vm3 = vcmp.eq.s32.totalorder %v441_v4, %v55_v6  ;;  %287 = vmatpush.bf16.msra.mxu2 %v414_v19 }
   0x7   :  { %vm340_vm4 = vmpackc.low %vm105_vm1, %vm103_vm0  ;;  %vm99_vm6 = vcmp.eq.s32.totalorder %v439_v3, %v52_v7  ;;  %vm101_vm7 = vcmp.eq.s32.totalorder %v439_v3, %v53_v8  ;;  %vm100_vm8 = vcmp.eq.s32.totalorder %v441_v4, %v52_v7  ;;  %vm102_vm9 = vcmp.eq.s32.totalorder %v441_v4, %v53_v8 }
   0x8   :  { %341 = vmatpush.bf16.xpose.msk.msra.mxu0 %vm340_vm4, %v418_v9  ;;  %vm358_vm5 = vmpackc.low %vm106_vm3, %vm104_vm2  ;;  %vm95_vm12 = vcmp.eq.s32.totalorder %v439_v3, %v50_v10  ;;  %vm97_vm13 = vcmp.eq.s32.totalorder %v439_v3, %v51_v11  ;;  %vm96_vm14 = vcmp.eq.s32.totalorder %v441_v4, %v50_v10  ;;  %vm98_vm15 = vcmp.eq.s32.totalorder %v441_v4, %v51_v11 }
   0x9   :  { %359 = vmatpush.bf16.xpose.msk.msra.mxu1 %vm358_vm5, %v418_v9  ;;  %vm342_vm10 = vmpackc.low %vm101_vm7, %vm99_vm6  ;;  %vm91_vm2 = vcmp.eq.s32.totalorder %v439_v3, %v48_v12  ;;  %vm93_vm3 = vcmp.eq.s32.totalorder %v439_v3, %v49_v13  ;;  %vm92_vm4 = vcmp.eq.s32.totalorder %v441_v4, %v48_v12  ;;  %vm94_vm5 = vcmp.eq.s32.totalorder %v441_v4, %v49_v13 }
   0xa   :  { %vm360_vm11 = vmpackc.low %vm102_vm9, %vm100_vm8  ;;  %v46_v14 = vadd.s32 48, %v437_v2  ;;  %v47_v15 = vadd.s32 56, %v437_v2  ;;  %v44_v16 = vadd.s32 32, %v437_v2  ;;  %v45_v17 = vadd.s32 40, %v437_v2  ;;  %288 = vmatpush.bf16.msra.mxu2 %v413_v22 }
   0xb   :  { %vm344_vm0 = vmpackc.low %vm97_vm13, %vm95_vm12  ;;  %v42_v20 = vadd.s32 16, %v437_v2  ;;  %v43_v21 = vadd.s32 24, %v437_v2  ;;  %v41_v24 = vadd.s32 8, %v437_v2  ;;  %v31_v28 = vperm.slane %v24_v26, 0 }
   0xc   :  { %vm362_vm1 = vmpackc.low %vm98_vm15, %vm96_vm14  ;;  %vm87_vm8 = vcmp.eq.s32.totalorder %v439_v3, %v46_v14  ;;  %vm89_vm9 = vcmp.eq.s32.totalorder %v439_v3, %v47_v15  ;;  %vm83_vm14 = vcmp.eq.s32.totalorder %v439_v3, %v44_v16  ;;  %vm85_vm15 = vcmp.eq.s32.totalorder %v439_v3, %v45_v17 }
   0xd   :  { %vm346_vm6 = vmpackc.low %vm93_vm3, %vm91_vm2  ;;  %v32_v29 = vperm.slane %v24_v26, 1 }
   0xe   :  { %vm364_vm7 = vmpackc.low %vm94_vm5, %vm92_vm4  ;;  %vm79_vm4 = vcmp.eq.s32.totalorder %v439_v3, %v42_v20  ;;  %vm81_vm5 = vcmp.eq.s32.totalorder %v439_v3, %v43_v21  ;;  %289 = vmatpush.bf16.msra.mxu2 %v412_v23 }
   0xf   :  { %vm348_vm12 = vmpackc.low %vm89_vm9, %vm87_vm8 }
  0x10   :  { %343 = vmatpush.bf16.xpose.msk.msra.mxu0 %vm342_vm10, %v418_v9  ;;  %vm88_vm10 = vcmp.eq.s32.totalorder %v441_v4, %v46_v14  ;;  %vm350_vm2 = vmpackc.low %vm85_vm15, %vm83_vm14 }
  0x11   :  { %361 = vmatpush.bf16.xpose.msk.msra.mxu1 %vm360_vm11, %v418_v9  ;;  %vm90_vm11 = vcmp.eq.s32.totalorder %v441_v4, %v47_v15  ;;  %vm352_vm8 = vmpackc.low %vm81_vm5, %vm79_vm4 }
  0x12   :  { %vm366_vm13 = vmpackc.low %vm90_vm11, %vm88_vm10  ;;  %vm75_vm10 = vcmp.eq.s32.totalorder %v439_v3, %v437_v2  ;;  %vm77_vm11 = vcmp.eq.s32.totalorder %v439_v3, %v41_v24  ;;  %290 = vmatpush.bf16.msra.mxu2 %v411_v25 }
  0x13   :  { %vm354_vm14 = vmpackc.low %vm77_vm11, %vm75_vm10 }
  0x16   :  { %291 = vmatpush.bf16.msra.mxu2 %v410_v27 }
  0x18   :  { %345 = vmatpush.bf16.xpose.msk.msra.mxu0 %vm344_vm0, %v418_v9  ;;  %vm84_vm0 = vcmp.eq.s32.totalorder %v441_v4, %v44_v16 }
  0x19   :  { %363 = vmatpush.bf16.xpose.msk.msra.mxu1 %vm362_vm1, %v418_v9  ;;  %vm86_vm1 = vcmp.eq.s32.totalorder %v441_v4, %v45_v17 }
  0x1a   :  { %vm368_vm3 = vmpackc.low %vm86_vm1, %vm84_vm0  ;;  %vm33_vm0 = vcmp.eq.s32.totalorder %v31_v28, %v437_v2  ;;  %vm34_vm1 = vcmp.eq.s32.totalorder %v32_v29, %v437_v2  ;;  %292 = vmatpush.bf16.msra.mxu2 %v409_v30 }
  0x1e   :  { %293 = vmatpush.bf16.msra.mxu2 %v408_v31 }
  0x20   :  { %347 = vmatpush.bf16.xpose.msk.msra.mxu0 %vm346_vm6, %v418_v9  ;;  %vm80_vm6 = vcmp.eq.s32.totalorder %v441_v4, %v42_v20 }
  0x21   :  { %365 = vmatpush.bf16.xpose.msk.msra.mxu1 %vm364_vm7, %v418_v9  ;;  %vm82_vm7 = vcmp.eq.s32.totalorder %v441_v4, %v43_v21 }
  0x22   :  { %vm370_vm9 = vmpackc.low %vm82_vm7, %vm80_vm6 }
  0x28   :  { %349 = vmatpush.bf16.xpose.msk.msra.mxu0 %vm348_vm12, %v418_v9  ;;  %vm76_vm12 = vcmp.eq.s32.totalorder %v441_v4, %v437_v2 }
  0x29   :  { %367 = vmatpush.bf16.xpose.msk.msra.mxu1 %vm366_vm13, %v418_v9  ;;  %vm78_vm13 = vcmp.eq.s32.totalorder %v441_v4, %v41_v24 }
  0x2a   :  { %vm372_vm15 = vmpackc.low %vm78_vm13, %vm76_vm12 }
  0x30   :  { %351 = vmatpush.bf16.xpose.msk.msra.mxu0 %vm350_vm2, %v418_v9  ;;  %vm356_vm2 = vmpackc.low %vm33_vm0, %vm33_vm0 }
  0x31   :  { %369 = vmatpush.bf16.xpose.msk.msra.mxu1 %vm368_vm3, %v418_v9  ;;  %vm374_vm3 = vmpackc.low %vm34_vm1, %vm34_vm1 }
  0x38   :  { %353 = vmatpush.bf16.xpose.msk.msra.mxu0 %vm352_vm8, %v418_v9 }
  0x39   :  { %371 = vmatpush.bf16.xpose.msk.msra.mxu1 %vm370_vm9, %v418_v9 }
  0x40   :  { %355 = vmatpush.bf16.xpose.msk.msra.mxu0 %vm354_vm14, %v418_v9 }
  0x41   :  { %373 = vmatpush.bf16.xpose.msk.msra.mxu1 %vm372_vm15, %v418_v9 }
  0x47   :  { %357 = vmatmul.msk.bf16.vlgmr.msra.gmra.mxu0 %vm356_vm2, %v418_v9 }
  0x48   :  { %375 = vmatmul.msk.bf16.vlgmr.msra.gmra.mxu1 %vm374_vm3, %v418_v9 }
  0xc4   :  { %v197_v32 = vpop.f32.mrf.mxu0 }
  0xc5   :  { %v210_v33 = vpop.f32.mrf.mxu1 }
  0xc6   :  { %v211_v34 = vadd.f32 %v210_v33, %v197_v32 }
  0xc8   :  { %v221_v35 = vpack.c.bf16 %v211_v34, %v211_v34 }
  0xca   :  { %294 = vmatmul.bf16.vlgmr.msra.gmra.mxu2 %v221_v35 }
  0xcc   :  { %v199_v36 = vpop.f32.mrf.mxu0 }
  0xcd   :  { %v212_v37 = vpop.f32.mrf.mxu1 }
 0x14d   :  { %v295_v38 = vpop.f32.mrf.mxu2 }
 0x14e   :  { %300 = vst [vmem:[%s544_s2] sm:$0xff] %v295_v38 }
 0x155   :  { %v297_v39 = vpop.f32.mrf.mxu2 }

</bundles_post_ra>
